<compile_context>
chip_gen: v7x
topology: tpu7x:2x2x1
jax: 0.10.0
libtpu: 0.0.40
codegen_flags: <defaults>
</compile_context>

<pallas_src>
import jax
import jax.numpy as jnp
from jax.experimental import pallas as pl
from jax.experimental.pallas import tpu as pltpu


def _patch_embed_kernel(p_ref, w_ref, pos_ref, o_ref):
    # p_ref:   (tm, K)  patch rows for r whole images (tm = r*N), streamed
    # w_ref:   (K, D)   flattened conv weight (resident)
    # pos_ref: (tm, D)  pos_embed with conv bias folded in, pre-tiled, f32 (resident)
    # o_ref:   (tm, D)  output block
    acc = jnp.dot(p_ref[...], w_ref[...], preferred_element_type=jnp.float32)
    o_ref[...] = (acc + pos_ref[...]).astype(o_ref.dtype)


def patch_embed_pallas(x_nchw, conv_w, conv_b, pos_embed, patch_size, *,
                       target_rows=512, compute_dtype=None):
    """x_nchw: (B, C, H, W); conv_w: (D, C, P, P); conv_b: (D,); pos_embed: (1, N, D).

    target_rows:   desired MXU M-rows per grid step (rounded to whole images).
    compute_dtype: dtype fed to the MXU (e.g. jnp.bfloat16); accumulation stays f32.
    """
    B, C, H, W = x_nchw.shape
    P = patch_size
    D = conv_w.shape[0]
    assert H % P == 0 and W % P == 0, "img_size must be divisible by patch_size"
    Hp, Wp = H // P, W // P
    N = Hp * Wp
    K = C * P * P
    out_dtype = x_nchw.dtype
    cdt = compute_dtype if compute_dtype is not None else x_nchw.dtype

    # --- layout glue: (B, C, H, W) -> flat patch matrix (B*N, K), K = (c, ph, pw) ---
    # TODO(synk): fold this transpose into the pallas input DMA
    # (allow_input_fusion / in-kernel gather) to remove one HBM round trip.
    patches = x_nchw.reshape(B, C, Hp, P, Wp, P)
    patches = jnp.transpose(patches, (0, 2, 4, 1, 3, 5)).reshape(B * N, K).astype(cdt)

    # conv weight (D, C, P, P) -> (K, D); bias folded into pos table (f32).
    w_flat = jnp.transpose(conv_w.reshape(D, K)).astype(cdt)                 # (K, D)
    posb = pos_embed.reshape(N, D).astype(jnp.float32) \
        + conv_b.astype(jnp.float32)[None, :]                                # (N, D)

    in_isz = jnp.dtype(cdt).itemsize
    out_isz = jnp.dtype(out_dtype).itemsize

    # --- tile selection: r whole images per grid step -> tm = r*N rows -------
    # Keep the double-buffered in/out blocks inside a VMEM budget that is safe
    # on v7x (64 MiB physical) as well as v5e/v6e (128 MiB).
    block_budget = 16 * 1024 * 1024
    per_image = N * (K * in_isz + D * out_isz)
    r_budget = max(1, block_budget // (2 * per_image))
    r = max(1, min(B, max(1, target_rows // N), r_budget))
    while B % r:                       # whole number of grid steps
        r -= 1
    tm = r * N

    # pre-tile the pos/bias table to the block height -> kernel add is a plain
    # elementwise add on identically shaped (tm, D) tiles (no broadcast/reshape).
    posb_tiled = jnp.tile(posb, (r, 1))                                      # (tm, D)

    resident = 2 * (K * D * in_isz + tm * D * 4)          # weight + pos tables
    streamed = 2 * tm * (K * in_isz + D * out_isz)        # double-buffered in/out
    vmem_limit = int(min(64 * 1024 * 1024,
                         max(32 * 1024 * 1024,
                             streamed + resident + (8 << 20))))

    grid = (B // r,)

    out = pl.pallas_call(
        _patch_embed_kernel,
        out_shape=jax.ShapeDtypeStruct((B * N, D), out_dtype),
        grid_spec=pltpu.PrefetchScalarGridSpec(
            num_scalar_prefetch=0,
            grid=grid,
            in_specs=[
                pl.BlockSpec((tm, K), lambda i: (i, 0)),     # patches (streamed)
                pl.BlockSpec((K, D), lambda i: (0, 0)),      # weight   (resident)
                pl.BlockSpec((tm, D), lambda i: (0, 0)),     # pos+bias (resident)
            ],
            out_specs=pl.BlockSpec((tm, D), lambda i: (i, 0)),
        ),
        compiler_params=pltpu.CompilerParams(
            dimension_semantics=("parallel",),
            vmem_limit_bytes=vmem_limit,
        ),
    )(patches, w_flat, posb_tiled)
    return out.reshape(B, N, D)


def patch_embed_reference(x_nchw, conv_w, conv_b, pos_embed, patch_size):
    """Pure-JAX reference using a real strided convolution (NCHW, OIHW)."""
    y = jax.lax.conv_general_dilated(
        x_nchw, conv_w,
        window_strides=(patch_size, patch_size),
        padding="VALID",
        dimension_numbers=("NCHW", "OIHW", "NCHW"),
    )
    y = y + conv_b.reshape(1, -1, 1, 1)
    B, D, Hp, Wp = y.shape
    y = y.reshape(B, D, Hp * Wp)            # flatten(start_dim=2)
    y = jnp.transpose(y, (0, 2, 1))         # transpose(1, 2)
    return y + pos_embed


if __name__ == "__main__":
    # Small shapes consistent with the module: img_size=16, patch_size=4,
    # in_chans=4, embed_dim=32  ->  N = 16, K = 64.
    B, C, IMG, P, D = 4, 4, 16, 4, 32
    N = (IMG // P) ** 2

    key = jax.random.PRNGKey(0)
    kx, kw, kb, kp = jax.random.split(key, 4)

    x = jax.random.normal(kx, (B, C, IMG, IMG), dtype=jnp.float32)
    conv_w = jax.random.normal(kw, (D, C, P, P), dtype=jnp.float32) * 0.05
    conv_b = jax.random.normal(kb, (D,), dtype=jnp.float32) * 0.05
    # Module init uses zeros for pos_embed; use small nonzero values here so
    # the addition path is actually exercised (synthetic, deterministic).
    pos_embed = jax.random.normal(kp, (1, N, D), dtype=jnp.float32) * 0.02

    ref = patch_embed_reference(x, conv_w, conv_b, pos_embed, P)

    # Default (single grid step at this tiny size).
    out = patch_embed_pallas(x, conv_w, conv_b, pos_embed, P)
    out = jax.block_until_ready(out)
    assert out.shape == (B, N, D), out.shape
    assert jnp.allclose(out, ref, atol=1e-4, rtol=1e-4), "f32 mismatch vs reference"

    # f32 path with target_rows=32 -> r=2 images per step -> grid of 2 steps
    # (exercises the multi-step pipeline even at this tiny size).
    out_multi = patch_embed_pallas(x, conv_w, conv_b, pos_embed, P, target_rows=32)
    out_multi = jax.block_until_ready(out_multi)
    assert jnp.allclose(out_multi, ref, atol=1e-4, rtol=1e-4), "f32 multi-step mismatch"

    # bf16 MXU path (f32 accumulation + f32 pos/bias add), loose tolerance.
    out_bf16 = patch_embed_pallas(x, conv_w, conv_b, pos_embed, P,
                                  target_rows=32, compute_dtype=jnp.bfloat16)
    out_bf16 = jax.block_until_ready(out_bf16)
    assert out_bf16.shape == (B, N, D), out_bf16.shape
    assert jnp.allclose(out_bf16, ref, atol=1e-1, rtol=1e-1), "bf16 mismatch vs reference"

    print("KERNEL_OK")
</pallas_src>

<mosaic_0001>
module attributes {stable_mosaic.version = 11 : i64} {
  func.func @_patch_embed_kernel(%arg0: i32, %arg1: memref<64x64xf32, #tpu.memory_space<vmem>>, %arg2: memref<64x32xf32, #tpu.memory_space<vmem>>, %arg3: memref<64x32xf32, #tpu.memory_space<vmem>>, %arg4: memref<64x32xf32, #tpu.memory_space<vmem>>) attributes {dimension_semantics = [#tpu.dimension_semantics<parallel>], iteration_bounds = array<i64: 1>, scalar_prefetch = 0 : i64, scratch_operands = 0 : i64, tpu.core_type = #tpu.core_type<tc>, window_params = [{transform_indices = @transform_0, window_bounds = array<i64: 64, 64>}, {pipeline_mode = #tpu.pipeline_mode<synchronous>, transform_indices = @transform_1, window_bounds = array<i64: 64, 32>}, {pipeline_mode = #tpu.pipeline_mode<synchronous>, transform_indices = @transform_2, window_bounds = array<i64: 64, 32>}, {transform_indices = @transform_3, window_bounds = array<i64: 64, 32>}]} {
    %c0 = arith.constant 0 : index
    %c0_0 = arith.constant 0 : index
    %0 = vector.load %arg1[%c0, %c0_0] : memref<64x64xf32, #tpu.memory_space<vmem>>, vector<64x64xf32>
    %c0_1 = arith.constant 0 : index
    %c0_2 = arith.constant 0 : index
    %1 = vector.load %arg2[%c0_1, %c0_2] : memref<64x32xf32, #tpu.memory_space<vmem>>, vector<64x32xf32>
    %cst = arith.constant dense<0.000000e+00> : vector<64x32xf32>
    %2 = tpu.matmul %0, %1, %cst {dimension_numbers = #tpu.dot_dimension_numbers<[1], [0], [0], [1], [0, 0, 1, 1], [], []>} : vector<64x64xf32>, vector<64x32xf32>, vector<64x32xf32> -> vector<64x32xf32>
    %c0_3 = arith.constant 0 : index
    %c0_4 = arith.constant 0 : index
    %3 = vector.load %arg3[%c0_3, %c0_4] : memref<64x32xf32, #tpu.memory_space<vmem>>, vector<64x32xf32>
    %4 = arith.addf %2, %3 : vector<64x32xf32>
    %c0_5 = arith.constant 0 : index
    %c0_6 = arith.constant 0 : index
    %5 = vector.load %arg4[%c0_5, %c0_6] : memref<64x32xf32, #tpu.memory_space<vmem>>, vector<64x32xf32>
    tpu.vector_store %arg4[%c0_5, %c0_6], %4 {strides = array<i32>} : memref<64x32xf32, #tpu.memory_space<vmem>>, vector<64x32xf32>,
    return
  }
  func.func @transform_0(%arg0: i32) -> (i32, i32) {
    %c0_i32 = arith.constant 0 : i32
    %c0_i32_0 = arith.constant 0 : i32
    return %arg0, %c0_i32 : i32, i32
  }
  func.func @transform_1(%arg0: i32) -> (i32, i32) {
    %c0_i32 = arith.constant 0 : i32
    %c0_i32_0 = arith.constant 0 : i32
    %c0_i32_1 = arith.constant 0 : i32
    return %c0_i32, %c0_i32_0 : i32, i32
  }
  func.func @transform_2(%arg0: i32) -> (i32, i32) {
    %c0_i32 = arith.constant 0 : i32
    %c0_i32_0 = arith.constant 0 : i32
    %c0_i32_1 = arith.constant 0 : i32
    return %c0_i32, %c0_i32_0 : i32, i32
  }
  func.func @transform_3(%arg0: i32) -> (i32, i32) {
    %c0_i32 = arith.constant 0 : i32
    %c0_i32_0 = arith.constant 0 : i32
    return %arg0, %c0_i32 : i32, i32
  }
}

</mosaic_0001>

<bundles_post_ra>
// kernel: tpu_custom_call.1
= control target key start
LH: loop header
LB: loop body
LE: loop exit
PB: predicated region body
PF: predicated region fallthrough
CT: control target
= control target key end

     0   :  { %vm38_vm0 = vcmask 523264   ;;  %vm168_vm1 = vcmask 261120   ;;  %s389_s1 = inlined_call_operand.vmem [shape: f32[64,32], index: 1, kind: input, shape index: {}]   ;;  %s390_s0 = inlined_call_operand.vmem [shape: f32[64,64], index: 0, kind: input, shape index: {}]   ;;  %s391_s2 = inlined_call_operand.vmem [shape: f32[64,32], index: 2, kind: input, shape index: {}]   ;;  %s392_s3 = inlined_call_operand.vmem [shape: f32[64,32], index: 3, kind: output, shape index: {}]  }
   0x1   :  { %v22_v0 = vld [vmem:[%s389_s1] sm:$0xff]  ;;  %v23_v1 = vld [vmem:[%s389_s1 + $0x8] sm:$0xff]  ;;  %v24_v2 = vld [vmem:[%s389_s1 + $0x10] sm:$0xff] }
   0x2   :  { %v233_v3 = vpack.c.bf16 %v23_v1, %v22_v0  ;;  %v25_v4 = vld [vmem:[%s389_s1 + $0x18] sm:$0xff]  ;;  %v26_v6 = vld [vmem:[%s389_s1 + $0x20] sm:$0xff]  ;;  %v27_v7 = vld [vmem:[%s389_s1 + $0x28] sm:$0xff] }
   0x3   :  { %v237_v5 = vpack.c.bf16 %v25_v4, %v24_v2  ;;  %v14_v8 = vld [vmem:[%s390_s0] sm:$0xff]  ;;  %v241_v10 = vpack.c.bf16 %v27_v7, %v26_v6  ;;  %v28_v11 = vld [vmem:[%s389_s1 + $0x30] sm:$0xff]  ;;  %v29_v12 = vld [vmem:[%s389_s1 + $0x38] sm:$0xff] }
   0x4   :  { %234 = vmatprep.subr.bf16.mxu0 %v233_v3  ;;  %249 = vmatprep.subr.bf16.mxu1 %v233_v3  ;;  %v18_v9 = vld [vmem:[%s390_s0 + $0x20] sm:$0xff]  ;;  %v245_v13 = vpack.c.bf16 %v29_v12, %v28_v11  ;;  %v15_v14 = vld [vmem:[%s390_s0 + $0x8] sm:$0xff]  ;;  %v16_v16 = vld [vmem:[%s390_s0 + $0x10] sm:$0xff] }
   0x5   :  { %236 = vmatpush3.bf16.msra.mxu0 %v233_v3  ;;  %253 = vmatpush3.bf16.msra.mxu1 %v233_v3  ;;  %v19_v15 = vld [vmem:[%s390_s0 + $0x28] sm:$0xff]  ;;  %v20_v17 = vld [vmem:[%s390_s0 + $0x30] sm:$0xff]  ;;  %v17_v18 = vld [vmem:[%s390_s0 + $0x18] sm:$0xff] }
   0x6   :  { %238 = vmatprep.subr.bf16.mxu0 %v237_v5  ;;  %250 = vmatprep.subr.bf16.mxu1 %v237_v5  ;;  %v21_v19 = vld [vmem:[%s390_s0 + $0x38] sm:$0xff]  ;;  %v31_v20 = vld [vmem:[%s391_s2 + $0x8] sm:$0xff]  ;;  %v30_v22 = vld [vmem:[%s391_s2] sm:$0xff] }
   0x7   :  { %221 = vmatprep.mubr.msk.f32.mxu0 %vm38_vm0, %v14_v8  ;;  %227 = vmatprep.mubr.msk.f32.mxu1 %vm38_vm0, %v18_v9  ;;  %v35_v21 = vld [vmem:[%s391_s2 + $0x28] sm:$0xff]  ;;  %v34_v23 = vld [vmem:[%s391_s2 + $0x20] sm:$0xff]  ;;  %v33_v32 = vld [vmem:[%s391_s2 + $0x18] sm:$0xff] }
   0x8   :  { %v37_v33 = vld [vmem:[%s391_s2 + $0x38] sm:$0xff]  ;;  %v32_v34 = vld [vmem:[%s391_s2 + $0x10] sm:$0xff] }
   0x9   :  { %240 = vmatpush3.bf16.msra.mxu0 %v237_v5  ;;  %254 = vmatpush3.bf16.msra.mxu1 %v237_v5  ;;  %v36_v35 = vld [vmem:[%s391_s2 + $0x30] sm:$0xff] }
   0xa   :  { %242 = vmatprep.subr.bf16.mxu0 %v241_v10  ;;  %251 = vmatprep.subr.bf16.mxu1 %v241_v10 }
   0xd   :  { %244 = vmatpush3.bf16.msra.mxu0 %v241_v10  ;;  %255 = vmatpush3.bf16.msra.mxu1 %v241_v10 }
   0xe   :  { %246 = vmatprep.subr.bf16.mxu0 %v245_v13  ;;  %252 = vmatprep.subr.bf16.mxu1 %v245_v13 }
  0x11   :  { %248 = vmatpush3.bf16.msra.mxu0 %v245_v13  ;;  %256 = vmatpush3.bf16.msra.mxu1 %v245_v13 }
  0x14   :  { %222 = vmatmul.mubr.msk.f32.vlgmr.msra.gmra.mrb[0].mxu0 %vm38_vm0, %v15_v14  ;;  %228 = vmatmul.mubr.msk.f32.vlgmr.msra.gmra.mrb[0].mxu1 %vm38_vm0, %v19_v15 }
  0x15   :  { %224 = vmatprep.mubr.msk.f32.mxu0 %vm38_vm0, %v16_v16  ;;  %230 = vmatprep.mubr.msk.f32.mxu1 %vm38_vm0, %v20_v17 }
  0x18   :  { %225 = vmatmul.mubr.msk.f32.gmra.mrb[2].mxu0 %vm38_vm0, %v17_v18  ;;  %231 = vmatmul.mubr.msk.f32.gmra.mrb[2].mxu1 %vm38_vm0, %v21_v19 }
  0xe7   :  { %v223_v24 = vpop.f32.mrb[0].mxu0  ;;  %v229_v25 = vpop.f32.mrb[0].mxu1 }
  0xe8   :  { %v135_v26 = vadd.f32 %v223_v24, %v31_v20  ;;  %v155_v27 = vadd.f32 %v229_v25, %v35_v21  ;;  %v129_v28 = vpop.f32.mrb[1].mxu0  ;;  %v149_v29 = vpop.f32.mrb[1].mxu1 }
  0xe9   :  { %v130_v30 = vadd.f32 %v129_v28, %v30_v22  ;;  %v150_v31 = vadd.f32 %v149_v29, %v34_v23 }
  0xea   :  { %170 = vst.msk [vmem:[%s392_s3 + $0x8] sm:$0xff] %vm168_vm1, %v135_v26  ;;  %174 = vst.msk [vmem:[%s392_s3 + $0x28] sm:$0xff] %vm168_vm1, %v155_v27 }
  0xeb   :  { %169 = vst.msk [vmem:[%s392_s3] sm:$0xff] %vm168_vm1, %v130_v30  ;;  %173 = vst.msk [vmem:[%s392_s3 + $0x20] sm:$0xff] %vm168_vm1, %v150_v31  ;;  %v226_v36 = vpop.f32.mrb[2].mxu0  ;;  %v232_v37 = vpop.f32.mrb[2].mxu1 }
  0xec   :  { %v145_v38 = vadd.f32 %v226_v36, %v33_v32  ;;  %v165_v39 = vadd.f32 %v232_v37, %v37_v33  ;;  %v139_v40 = vpop.f32.mrb[3].mxu0  ;;  %v159_v41 = vpop.f32.mrb[3].mxu1 }
  0xed   :  { %v140_v42 = vadd.f32 %v139_v40, %v32_v34  ;;  %v160_v43 = vadd.f32 %v159_v41, %v36_v35 }
  0xee   :  { %172 = vst.msk [vmem:[%s392_s3 + $0x18] sm:$0xff] %vm168_vm1, %v145_v38  ;;  %176 = vst.msk [vmem:[%s392_s3 + $0x38] sm:$0xff] %vm168_vm1, %v165_v39 }
  0xef   :  { %171 = vst.msk [vmem:[%s392_s3 + $0x10] sm:$0xff] %vm168_vm1, %v140_v42  ;;  %175 = vst.msk [vmem:[%s392_s3 + $0x30] sm:$0xff] %vm168_vm1, %v160_v43 }

</bundles_post_ra>
